<compile_context>
chip_gen: v7x
topology: tpu7x:2x2x1
jax: 0.10.0
libtpu: 0.0.40
codegen_flags: <defaults>
</compile_context>

<pallas_src>
import functools

import jax
import jax.numpy as jnp
from jax.experimental import pallas as pl
from jax.experimental.pallas import tpu as pltpu

_MIB = 1024 * 1024


def _vmem_capacity_bytes():
    try:
        return int(pltpu.get_tpu_info().vmem_capacity_bytes)
    except Exception:
        return 64 * _MIB   # conservative: v7x physical VMEM per TensorCore


def _pick_tiling(rows, hw, itemsize):
    """Return (tile_rows, grid_steps) for a (rows, hw) level.

    Per-input blocks are capped at ~2 MiB: the body holds ~5 full-tile f32
    temporaries on top of 2 inputs x 2 pipeline buffers, so this keeps the
    working set well under v7x's 64 MiB VMEM while mem-bound tiles already sit
    near the HBM roofline at this size.  rows > 512 always get a multi-step
    grid so the "parallel" axis can shard across v7x's two TensorCores.
    """
    block_budget = min(2 * _MIB, _vmem_capacity_bytes() // 32)
    row_bytes = hw * itemsize

    # Small level: one full-array block (block dims == array dims, so the
    # (8,128) divisibility constraint does not apply and no padding is needed).
    if rows * row_bytes <= block_budget and rows <= 512:
        return rows, 1

    rows_per_block = block_budget // row_bytes
    if rows_per_block >= 128:
        target = max(128, (rows // 4) // 128 * 128)   # aim for >= 4 grid steps
        tile_rows = max(128, min((rows_per_block // 128) * 128, target))
    else:
        # Very large H*W: small sublane-aligned row tiles.
        # TODO(synk): add an hw-split grid axis (online-softmax accumulation)
        # for spatial maps too large to fit even a few rows in VMEM.
        tile_rows = max(8, (rows_per_block // 8) * 8)

    if tile_rows >= rows:
        return rows, 1
    return tile_rows, pl.cdiv(rows, tile_rows)


def _cwd_row_kernel(t_ref, s_ref, out_ref, *, tile_rows, total_rows):
    """Per-row partial sums of p_T * (log p_T - log p_S) for one row tile.

    Softmax is over the lane (spatial) axis; logits are scaled by 1/4 (the
    distillation temperature), folded into the shifted logits (max commutes
    with positive scaling).  out_ref is a (tile_rows, 1) column of row sums.
    """
    inv_temp = jnp.float32(0.25)
    t = t_ref[...].astype(jnp.float32)
    s = s_ref[...].astype(jnp.float32)

    t_sh = (t - jnp.max(t, axis=1, keepdims=True)) * inv_temp
    s_sh = (s - jnp.max(s, axis=1, keepdims=True)) * inv_temp

    exp_t = jnp.exp(t_sh)                                     # reused for p_T
    sum_t = jnp.sum(exp_t, axis=1, keepdims=True)             # (rows, 1)
    sum_s = jnp.sum(jnp.exp(s_sh), axis=1, keepdims=True)     # (rows, 1)

    # p_T * (log p_T - log p_S)
    #   = exp_t / sum_t * ((t_sh - s_sh) + (log sum_s - log sum_t))
    # Only 5 full-tile VALU ops + 2 full-tile EUP exps; the reciprocal / logs
    # act on (rows, 1) columns and are negligible.
    log_ratio = jnp.log(sum_s) - jnp.log(sum_t)               # (rows, 1)
    p_scale = 1.0 / sum_t                                     # (rows, 1), exact
    contrib = (exp_t * p_scale) * ((t_sh - s_sh) + log_ratio)
    row_sum = jnp.sum(contrib, axis=1, keepdims=True)         # (tile_rows, 1)

    if total_rows % tile_rows != 0:
        # Ragged last tile: rows past total_rows hold unspecified data; zero
        # them out (static no-op when tile_rows divides total_rows).
        base = pl.program_id(0) * tile_rows
        ridx = base + jax.lax.broadcasted_iota(jnp.int32, (tile_rows, 1), 0)
        row_sum = jnp.where(ridx < total_rows, row_sum, 0.0)

    out_ref[...] = row_sum


def _cwd_row_sums(t2, s2):
    """Per-row sums of p_T * (log p_T - log p_S) for a (rows, hw) level."""
    assert t2.shape == s2.shape and t2.ndim == 2
    rows, hw = t2.shape
    itemsize = jnp.dtype(t2.dtype).itemsize
    tile_rows, grid_steps = _pick_tiling(rows, hw, itemsize)
    padded_rows = tile_rows * grid_steps

    kernel = functools.partial(_cwd_row_kernel, tile_rows=tile_rows,
                               total_rows=rows)
    cost = pl.CostEstimate(
        flops=11 * rows * hw,
        transcendentals=2 * rows * hw,
        bytes_accessed=2 * rows * hw * itemsize + 4 * padded_rows,
    )
    vmem_limit = int(min((_vmem_capacity_bytes() * 3) // 4, 128 * _MIB))

    row_sums = pl.pallas_call(
        kernel,
        out_shape=jax.ShapeDtypeStruct((padded_rows, 1), jnp.float32),
        grid_spec=pltpu.PrefetchScalarGridSpec(
            num_scalar_prefetch=0,
            grid=(grid_steps,),
            in_specs=[
                pl.BlockSpec((tile_rows, hw), lambda i: (i, 0)),
                pl.BlockSpec((tile_rows, hw), lambda i: (i, 0)),
            ],
            out_specs=pl.BlockSpec((tile_rows, 1), lambda i: (i, 0)),
        ),
        compiler_params=pltpu.CompilerParams(
            dimension_semantics=("parallel",),
            vmem_limit_bytes=vmem_limit,
        ),
        cost_estimate=cost,
    )(t2, s2)
    return row_sums[:rows, 0]


def channel_wise_divergence(feat_t, feat_s):
    """Pallas version of ChannelWiseDivergence. feat_t/feat_s: (N, C, H, W)."""
    assert feat_t.shape[-2:] == feat_s.shape[-2:]
    assert feat_t.shape == feat_s.shape
    N, C, H, W = feat_s.shape
    rows, hw = N * C, H * W
    # reshape of a contiguous NCHW array is a free bitcast in XLA (no copy).
    row_sums = _cwd_row_sums(feat_t.reshape(rows, hw), feat_s.reshape(rows, hw))
    return jnp.sum(row_sums) * (4.0 ** 2) / (C * N)


def alignment_loss(x_guidance_feature, loss_weight):
    """Forward pass of AlignmentLoss.

    x_guidance_feature = (teacher_feats, student_feats), each a list of 4 NCHW
    arrays; loss_weight is a sequence of 4 scalars (module indexes it per
    level).  One pallas_call per level: the kernel is HBM-bound, so the
    wrapper does no concat / pad copies.
    """
    feats_t, feats_s = x_guidance_feature
    total = jnp.float32(0.0)
    for i in range(4):
        ft, fs = feats_t[i], feats_s[i]
        # TODO(synk): F.interpolate(..., mode='bilinear', align_corners=False)
        # resize branch (only taken when teacher/student spatial sizes differ)
        # is not implemented; inputs here must share spatial dims.
        assert ft.shape[-2:] == fs.shape[-2:] and ft.shape == fs.shape
        total = total + jnp.float32(loss_weight[i]) * channel_wise_divergence(ft, fs)
    return total


def _reference_loss(x_guidance_feature, loss_weight):
    """Pure-JAX reference matching the PyTorch semantics, for self-check."""
    feats_t, feats_s = x_guidance_feature
    total = jnp.float32(0.0)
    for i in range(4):
        ft, fs = feats_t[i], feats_s[i]
        N, C, H, W = fs.shape
        t2 = ft.reshape(-1, H * W) / 4.0
        s2 = fs.reshape(-1, H * W) / 4.0
        p_t = jax.nn.softmax(t2, axis=1)
        cwd = jnp.sum(p_t * jax.nn.log_softmax(t2, axis=1)
                      - p_t * jax.nn.log_softmax(s2, axis=1)) * (4.0 ** 2) / (C * N)
        total = total + loss_weight[i] * cwd
    return total


if __name__ == "__main__":
    key = jax.random.PRNGKey(0)
    # 4 FPN-style feature levels, small shapes: batch=2, channels=4.
    shapes = [(2, 4, 16, 16), (2, 4, 16, 16), (2, 4, 8, 8), (2, 4, 8, 8)]
    keys = jax.random.split(key, 2 * len(shapes))
    feats_t = [jax.random.normal(keys[i], s, jnp.float32)
               for i, s in enumerate(shapes)]
    feats_s = [jax.random.normal(keys[len(shapes) + i], s, jnp.float32)
               for i, s in enumerate(shapes)]
    loss_weight = (0.25, 0.5, 0.75, 1.0)   # module indexes loss_weight[i]

    loss = jax.block_until_ready(alignment_loss((feats_t, feats_s), loss_weight))
    ref = _reference_loss((feats_t, feats_s), loss_weight)
    assert jnp.allclose(loss, ref, rtol=1e-4, atol=1e-5), (loss, ref)

    # Also exercise the multi-step (tiled, ragged-tail-masked) grid path.
    kt, ks = jax.random.split(jax.random.PRNGKey(1))
    big_t = jax.random.normal(kt, (2, 300, 16, 16), jnp.float32)
    big_s = jax.random.normal(ks, (2, 300, 16, 16), jnp.float32)
    got = jax.block_until_ready(channel_wise_divergence(big_t, big_s))
    t2 = big_t.reshape(-1, 256) / 4.0
    s2 = big_s.reshape(-1, 256) / 4.0
    p_t = jax.nn.softmax(t2, axis=1)
    want = jnp.sum(p_t * jax.nn.log_softmax(t2, axis=1)
                   - p_t * jax.nn.log_softmax(s2, axis=1)) * (4.0 ** 2) / (300 * 2)
    assert jnp.allclose(got, want, rtol=1e-4, atol=1e-5), (got, want)

    print("KERNEL_OK")
</pallas_src>

<mosaic_0001>
module attributes {stable_mosaic.version = 11 : i64} {
  func.func @_cwd_row_kernel(%arg0: i32, %arg1: memref<8x256xf32, #tpu.memory_space<vmem>>, %arg2: memref<8x256xf32, #tpu.memory_space<vmem>>, %arg3: memref<8x1xf32, #tpu.memory_space<vmem>>) attributes {dimension_semantics = [#tpu.dimension_semantics<parallel>], iteration_bounds = array<i64: 1>, scalar_prefetch = 0 : i64, scratch_operands = 0 : i64, tpu.core_type = #tpu.core_type<tc>, window_params = [{transform_indices = @transform_0, window_bounds = array<i64: 8, 256>}, {transform_indices = @transform_1, window_bounds = array<i64: 8, 256>}, {transform_indices = @transform_2, window_bounds = array<i64: 8, 1>}]} {
    %c0 = arith.constant 0 : index
    %c0_0 = arith.constant 0 : index
    %0 = vector.load %arg1[%c0, %c0_0] : memref<8x256xf32, #tpu.memory_space<vmem>>, vector<8x256xf32>
    %c0_1 = arith.constant 0 : index
    %c0_2 = arith.constant 0 : index
    %1 = vector.load %arg2[%c0_1, %c0_2] : memref<8x256xf32, #tpu.memory_space<vmem>>, vector<8x256xf32>
    %cst = arith.constant dense<0xFF800000> : vector<8xf32>
    %2 = vector.multi_reduction <maximumf>, %0, %cst [1] : vector<8x256xf32> to vector<8xf32>
    %3 = vector.shape_cast %2 : vector<8xf32> to vector<8x1xf32>
    %4 = vector.broadcast %3 : vector<8x1xf32> to vector<8x256xf32>
    %5 = arith.subf %0, %4 : vector<8x256xf32>
    %cst_3 = arith.constant 2.500000e-01 : f32
    %6 = vector.broadcast %cst_3 : f32 to vector<8x256xf32>
    %7 = arith.mulf %5, %6 : vector<8x256xf32>
    %cst_4 = arith.constant dense<0xFF800000> : vector<8xf32>
    %8 = vector.multi_reduction <maximumf>, %1, %cst_4 [1] : vector<8x256xf32> to vector<8xf32>
    %9 = vector.shape_cast %8 : vector<8xf32> to vector<8x1xf32>
    %10 = vector.broadcast %9 : vector<8x1xf32> to vector<8x256xf32>
    %11 = arith.subf %1, %10 : vector<8x256xf32>
    %cst_5 = arith.constant 2.500000e-01 : f32
    %12 = vector.broadcast %cst_5 : f32 to vector<8x256xf32>
    %13 = arith.mulf %11, %12 : vector<8x256xf32>
    %14 = math.exp %7 : vector<8x256xf32>
    %cst_6 = arith.constant dense<0.000000e+00> : vector<8xf32>
    %15 = vector.multi_reduction <add>, %14, %cst_6 [1] : vector<8x256xf32> to vector<8xf32>
    %16 = vector.shape_cast %15 : vector<8xf32> to vector<8x1xf32>
    %17 = math.exp %13 : vector<8x256xf32>
    %cst_7 = arith.constant dense<0.000000e+00> : vector<8xf32>
    %18 = vector.multi_reduction <add>, %17, %cst_7 [1] : vector<8x256xf32> to vector<8xf32>
    %19 = vector.shape_cast %18 : vector<8xf32> to vector<8x1xf32>
    %20 = math.log %19 : vector<8x1xf32>
    %21 = math.log %16 : vector<8x1xf32>
    %22 = arith.subf %20, %21 : vector<8x1xf32>
    %cst_8 = arith.constant 1.000000e+00 : f32
    %23 = vector.broadcast %cst_8 : f32 to vector<8x1xf32>
    %24 = arith.divf %23, %16 : vector<8x1xf32>
    %25 = vector.broadcast %24 : vector<8x1xf32> to vector<8x256xf32>
    %26 = arith.mulf %14, %25 : vector<8x256xf32>
    %27 = arith.subf %7, %13 : vector<8x256xf32>
    %28 = vector.broadcast %22 : vector<8x1xf32> to vector<8x256xf32>
    %29 = arith.addf %27, %28 : vector<8x256xf32>
    %30 = arith.mulf %26, %29 : vector<8x256xf32>
    %cst_9 = arith.constant dense<0.000000e+00> : vector<8xf32>
    %31 = vector.multi_reduction <add>, %30, %cst_9 [1] : vector<8x256xf32> to vector<8xf32>
    %32 = vector.shape_cast %31 : vector<8xf32> to vector<8x1xf32>
    %c0_10 = arith.constant 0 : index
    %c0_11 = arith.constant 0 : index
    %33 = vector.load %arg3[%c0_10, %c0_11] : memref<8x1xf32, #tpu.memory_space<vmem>>, vector<8x1xf32>
    tpu.vector_store %arg3[%c0_10, %c0_11], %32 {strides = array<i32>} : memref<8x1xf32, #tpu.memory_space<vmem>>, vector<8x1xf32>,
    return
  }
  func.func @transform_0(%arg0: i32) -> (i32, i32) {
    %c0_i32 = arith.constant 0 : i32
    %c0_i32_0 = arith.constant 0 : i32
    return %arg0, %c0_i32 : i32, i32
  }
  func.func @transform_1(%arg0: i32) -> (i32, i32) {
    %c0_i32 = arith.constant 0 : i32
    %c0_i32_0 = arith.constant 0 : i32
    return %arg0, %c0_i32 : i32, i32
  }
  func.func @transform_2(%arg0: i32) -> (i32, i32) {
    %c0_i32 = arith.constant 0 : i32
    %c0_i32_0 = arith.constant 0 : i32
    return %arg0, %c0_i32 : i32, i32
  }
}

</mosaic_0001>

<bundles_post_ra>
// kernel: tpu_custom_call.1
= control target key start
LH: loop header
LB: loop body
LE: loop exit
PB: predicated region body
PF: predicated region fallthrough
CT: control target
= control target key end

     0   :  { %7 = vsyncpa [#allocation3], 0  ;;  %s201_s0 = inlined_call_operand.hbm [shape: f32[8,256], index: 0, kind: input, shape index: {}]   ;;  %s202_s1 = inlined_call_operand.hbm [shape: f32[8,256], index: 1, kind: input, shape index: {}]   ;;  %s203_s2 = inlined_call_operand.vmem [shape: f32[8,1], index: 2, kind: output, shape index: {}]  }
   0x1   :  { %8 = vsyncpa [#allocation5], 0  ;;  %s157_s9 = smov [#allocation2]   ;;  %s158_s11 = smov [#allocation4]  }
   0x2   :  { %s15_s10 = sshll.u32 %s157_s9, 4  ;;  %s25_s12 = sshll.u32 %s158_s11, 4  ;;  %s16_s10 = int_to_ptr.vmem [resolvable:$true] %s15_s10  ;;  %s26_s12 = int_to_ptr.vmem [resolvable:$true] %s25_s12 }
   0x3   :  { %s109_s15 = scalar_lea.hbm %s201_s0, 256 }
   0x4   :  { %p110_p0 = scmp.ne.s32.totalorder %s201_s0, %s109_s15  ;;  %p113_p1 = scmp.lt.u32.totalorder %s109_s15, %s201_s0 }
   0x6   :  { %p115_p2 = pnand %p113_p1, %p110_p0 }
   0x8   :  { %118 = shalt.err (!%p115_p2)
}
   0x9   :  { %s119_s20 = scalar_lea.vmem %s16_s10, 256  ;;  %p124_p4 = scmp.lt.s32.totalorder %s16_s10, %s16_s10 }
   0xa   :  { %p120_p3 = scmp.ne.s32.totalorder %s16_s10, %s119_s20  ;;  %p125_p5 = scmp.lt.s32.totalorder %s119_s20, %s119_s20 }
   0xc   :  { %p126_p6 = por %p125_p5, %p124_p4 }
   0xe   :  { %p127_p7 = pnand %p126_p6, %p120_p3 }
  0x10   :  { %130 = shalt.err (!%p127_p7)
}
  0x11   :  { %18 = dma.hbm_to_vmem [thread:$0]  %s201_s0, 256, %s16_s10, [#allocation3]  }
  0x12   :  { %s131_s25 = scalar_lea.hbm %s202_s1, 256 }
  0x13   :  { %p132_p8 = scmp.ne.s32.totalorder %s202_s1, %s131_s25  ;;  %p135_p9 = scmp.lt.u32.totalorder %s131_s25, %s202_s1 }
  0x15   :  { %p137_p10 = pnand %p135_p9, %p132_p8 }
  0x17   :  { %140 = shalt.err (!%p137_p10)
}
  0x18   :  { %s141_s30 = scalar_lea.vmem %s26_s12, 256  ;;  %p146_p12 = scmp.lt.s32.totalorder %s26_s12, %s26_s12 }
  0x19   :  { %p142_p11 = scmp.ne.s32.totalorder %s26_s12, %s141_s30  ;;  %p147_p13 = scmp.lt.s32.totalorder %s141_s30, %s141_s30 }
  0x1b   :  { %p148_p0 = por %p147_p13, %p146_p12 }
  0x1d   :  { %p149_p1 = pnand %p148_p0, %p142_p11 }
  0x1f   :  { %152 = shalt.err (!%p149_p1)
}
  0x20   :  { %28 = dma.hbm_to_vmem [thread:$0]  %s202_s1, 256, %s26_s12, [#allocation5]  }
  0x21   :  { %153 = dma.done.wait [#allocation3], 256  }
  0x22   :  { %154 = vsyncadd [#allocation3], 4294967040 }
  0x23   :  { %155 = dma.done.wait [#allocation5], 256  }
  0x24   :  { %156 = vsyncadd [#allocation5], 4294967040  ;;  %v35_v0 = vld [vmem:[#allocation2] sm:$0xff]  ;;  %v36_v1 = vld [vmem:[#allocation2 + $0x8] sm:$0xff]  ;;  %vm85_vm0 = vcmask 7168  }
  0x25   :  { %v37_v2 = vld [vmem:[#allocation4] sm:$0xff]  ;;  %v39_v3 = vmax.f32 %v35_v0, %v36_v1  ;;  %v38_v4 = vld [vmem:[#allocation4 + $0x8] sm:$0xff] }
  0x26   :  { %v46_v5 = vmax.f32 %v37_v2, %v38_v4 }
  0x27   :  { %40 = vmax.xlane.f32.xlu0 %v39_v3 }
  0x2b   :  { %47 = vmax.xlane.f32.xlu0 %v46_v5 }
  0xb4   :  { %v41_v6 = vpop.xlane.xlu0 %40 }
  0xb5   :  { %v42_v7 = vsub.f32 %v35_v0, %v41_v6  ;;  %v43_v8 = vsub.f32 %v36_v1, %v41_v6 }
  0xb7   :  { %v44_v9 = vmul.f32 0.25, %v42_v7  ;;  %v45_v10 = vmul.f32 0.25, %v43_v8 }
  0xb8   :  { %v48_v11 = vpop.xlane.xlu0 %47 }
  0xb9   :  { %v53_v12 = vmul.f32 1.442695, %v44_v9  ;;  %v55_v13 = vmul.f32 1.442695, %v45_v10  ;;  %v49_v14 = vsub.f32 %v37_v2, %v48_v11  ;;  %v50_v15 = vsub.f32 %v38_v4, %v48_v11 }
  0xbb   :  { %95 = vpow2.f32 %v53_v12  ;;  %v51_v16 = vmul.f32 0.25, %v49_v14  ;;  %v52_v17 = vmul.f32 0.25, %v50_v15 }
  0xbc   :  { %97 = vpow2.f32 %v55_v13 }
  0xbd   :  { %v60_v18 = vmul.f32 1.442695, %v51_v16  ;;  %v62_v19 = vmul.f32 1.442695, %v52_v17  ;;  %v76_v20 = vsub.f32 %v44_v9, %v51_v16  ;;  %v77_v21 = vsub.f32 %v45_v10, %v52_v17 }
  0xbf   :  { %99 = vpow2.f32 %v60_v18 }
  0xc0   :  { %101 = vpow2.f32 %v62_v19 }
  0xc5   :  { %v96_v22 = vpop.eup %95 }
  0xc6   :  { %v98_v23 = vpop.eup %97 }
  0xc7   :  { %v57_v24 = vadd.f32 %v98_v23, %v96_v22 }
  0xc9   :  { %v100_v25 = vpop.eup %99  ;;  %58 = vadd.xlane.f32.xlu1 %v57_v24 }
  0xca   :  { %v102_v26 = vpop.eup %101 }
  0xcb   :  { %v64_v27 = vadd.f32 %v102_v26, %v100_v25 }
  0xcd   :  { %65 = vadd.xlane.f32.xlu1 %v64_v27 }
 0x156   :  { %v59_v28 = vpop.xlane.xlu1 %58 }
 0x157   :  { %103 = vlog2.f32 %v59_v28 }
 0x15a   :  { %v66_v29 = vpop.xlane.xlu1 %65 }
 0x15b   :  { %105 = vlog2.f32 %v66_v29 }
 0x15c   :  { %107 = vrcp.f32 %v59_v28 }
 0x161   :  { %v104_v30 = vpop.eup %103 }
 0x162   :  { %v70_v32 = vmul.f32 0.6931472, %v104_v30 }
 0x165   :  { %v106_v31 = vpop.eup %105 }
 0x166   :  { %v68_v33 = vmul.f32 0.6931472, %v106_v31  ;;  %v108_v34 = vpop.eup %107 }
 0x167   :  { %v74_v36 = vmul.f32 %v108_v34, %v96_v22  ;;  %v75_v37 = vmul.f32 %v108_v34, %v98_v23 }
 0x168   :  { %v71_v35 = vsub.f32 %v68_v33, %v70_v32 }
 0x16a   :  { %v78_v38 = vadd.f32 %v76_v20, %v71_v35  ;;  %v79_v39 = vadd.f32 %v77_v21, %v71_v35 }
 0x16c   :  { %v80_v40 = vmul.f32 %v78_v38, %v74_v36  ;;  %v81_v41 = vmul.f32 %v79_v39, %v75_v37 }
 0x16e   :  { %v82_v42 = vadd.f32 %v81_v41, %v80_v40 }
 0x170   :  { %83 = vadd.xlane.f32.xlu0 %v82_v42 }
 0x1fd   :  { %v84_v43 = vpop.xlane.xlu0 %83 }
 0x1fe   :  { %86 = vst.msk [vmem:[%s203_s2] sm:$0xff] %vm85_vm0, %v84_v43 }
 0x1ff   :  { %91 = vsyncpa [#allocation3], 1 }
 0x200   :  { %92 = vsyncpa [#allocation5], 1 }

</bundles_post_ra>
